<compile_context>
chip_gen: v7x
topology: tpu7x:2x2x1
jax: 0.10.0
libtpu: 0.0.40
codegen_flags: <defaults>
</compile_context>

<pallas_src>
import functools
import math

import jax
import jax.numpy as jnp
from jax.experimental import pallas as pl
from jax.experimental.pallas import tpu as pltpu


# --------------------------- projection kernels ---------------------------

def _qk_proj_kernel(x_ref, y_ref, wq_ref, bq_ref, wk_ref, bk_ref, q_ref, k_ref):
    # x, y: (TN, d_in); w: (d_in, d_out); b: (1, d_out)
    q_ref[...] = (
        jnp.dot(x_ref[...], wq_ref[...], preferred_element_type=jnp.float32)
        + bq_ref[...]
    ).astype(q_ref.dtype)
    k_ref[...] = (
        jnp.dot(y_ref[...], wk_ref[...], preferred_element_type=jnp.float32)
        + bk_ref[...]
    ).astype(k_ref.dtype)


def qk_projection(x, y, wq, bq, wk, bk, *, max_tile_rows=256):
    """(q, k) = (x @ wq + bq, y @ wk + bk); single fused, row-tiled pallas_call."""
    n, d_in = x.shape
    d_out = wq.shape[1]
    tn = n if n <= max_tile_rows else max_tile_rows  # full rows when small, else 256-row tiles
    row_spec = pl.BlockSpec((tn, d_in), lambda i: (i, 0))
    w_spec = pl.BlockSpec((d_in, d_out), lambda i: (0, 0))   # resident weight block
    b_spec = pl.BlockSpec((1, d_out), lambda i: (0, 0))
    out_spec = pl.BlockSpec((tn, d_out), lambda i: (i, 0))
    return pl.pallas_call(
        _qk_proj_kernel,
        out_shape=(
            jax.ShapeDtypeStruct((n, d_out), x.dtype),
            jax.ShapeDtypeStruct((n, d_out), x.dtype),
        ),
        grid=(pl.cdiv(n, tn),),
        in_specs=[row_spec, row_spec, w_spec, b_spec, w_spec, b_spec],
        out_specs=(out_spec, out_spec),
        compiler_params=pltpu.CompilerParams(dimension_semantics=("parallel",)),
    )(x, y, wq, bq.reshape(1, d_out), wk, bk.reshape(1, d_out))


def _dual_out_proj_kernel(x1_ref, x2_ref, w_ref, b_ref, o1_ref, o2_ref):
    # Both streams share the same weight: one weight DMA, one launch.
    o1_ref[...] = (
        jnp.dot(x1_ref[...], w_ref[...], preferred_element_type=jnp.float32)
        + b_ref[...]
    ).astype(o1_ref.dtype)
    o2_ref[...] = (
        jnp.dot(x2_ref[...], w_ref[...], preferred_element_type=jnp.float32)
        + b_ref[...]
    ).astype(o2_ref.dtype)


def dual_output_projection(x1, x2, w, b, *, max_tile_rows=256):
    n, d_in = x1.shape
    d_out = w.shape[1]
    tn = n if n <= max_tile_rows else max_tile_rows
    row_spec = pl.BlockSpec((tn, d_in), lambda i: (i, 0))
    w_spec = pl.BlockSpec((d_in, d_out), lambda i: (0, 0))
    b_spec = pl.BlockSpec((1, d_out), lambda i: (0, 0))
    out_spec = pl.BlockSpec((tn, d_out), lambda i: (i, 0))
    return pl.pallas_call(
        _dual_out_proj_kernel,
        out_shape=(
            jax.ShapeDtypeStruct((n, d_out), x1.dtype),
            jax.ShapeDtypeStruct((n, d_out), x1.dtype),
        ),
        grid=(pl.cdiv(n, tn),),
        in_specs=[row_spec, row_spec, w_spec, b_spec],
        out_specs=(out_spec, out_spec),
        compiler_params=pltpu.CompilerParams(dimension_semantics=("parallel",)),
    )(x1, x2, w, b.reshape(1, d_out))


# ----------------------------- attention kernel -----------------------------

def _attn_kernel(q_ref, k_ref, v1_ref, v2_ref, x1_ref, x2_ref, *, h, scale):
    # q/k/v refs: (1, S, h, d_k) — one batch element, ALL heads per grid step.
    # Outputs:    (1, S, h*d_k)  — lane-dense stores.
    # (S, h, d_k) -> (h, S, d_k): canonical layout for batched matmuls.
    q = jnp.transpose(q_ref[0], (1, 0, 2)) * scale  # fold 1/sqrt(d_k) into q (S*d_k elems, not S*S)
    k = jnp.transpose(k_ref[0], (1, 0, 2))
    v1 = jnp.transpose(v1_ref[0], (1, 0, 2))
    v2 = jnp.transpose(v2_ref[0], (1, 0, 2))

    # scores: contract the last dims directly — no explicit .T feeding the MXU.
    s = jnp.einsum("hqd,hkd->hqk", q, k, preferred_element_type=jnp.float32)

    # numerically-stable softmax; one reciprocal per row + multiply (no per-element divide).
    m = jnp.max(s, axis=-1, keepdims=True)
    e = jnp.exp(s - m)
    l = jnp.sum(e, axis=-1, keepdims=True)
    p = e * pl.reciprocal(l, approx=False)  # approx=False keeps 1e-5 parity with the reference

    x1 = jnp.einsum("hqk,hkd->hqd", p, v1, preferred_element_type=jnp.float32)  # p   @ v1
    x2 = jnp.einsum("hqk,hqd->hkd", p, v2, preferred_element_type=jnp.float32)  # p^T @ v2 (no .T)

    # (h, S, d_k) -> (S, h*d_k) head-major feature merge, then one dense store.
    x1_ref[0] = jnp.concatenate([x1[i] for i in range(h)], axis=-1).astype(x1_ref.dtype)
    x2_ref[0] = jnp.concatenate([x2[i] for i in range(h)], axis=-1).astype(x2_ref.dtype)


def attention_core(qh, kh, v1h, v2h):
    """qh/kh/v1h/v2h: (B, S, h, d_k) -> (x1, x2) each (B, S, h*d_k)."""
    B, S, h, d_k = qh.shape
    d_model = h * d_k
    in_spec = pl.BlockSpec((1, S, h, d_k), lambda b: (b, 0, 0, 0))
    out_spec = pl.BlockSpec((1, S, d_model), lambda b: (b, 0, 0))
    kernel = functools.partial(_attn_kernel, h=h, scale=1.0 / math.sqrt(d_k))
    return pl.pallas_call(
        kernel,
        out_shape=(
            jax.ShapeDtypeStruct((B, S, d_model), qh.dtype),
            jax.ShapeDtypeStruct((B, S, d_model), qh.dtype),
        ),
        grid=(B,),
        in_specs=[in_spec, in_spec, in_spec, in_spec],
        out_specs=(out_spec, out_spec),
        compiler_params=pltpu.CompilerParams(dimension_semantics=("parallel",)),
    )(qh, kh, v1h, v2h)


# ------------------------------- module glue -------------------------------

def multi_headed_attention_con(params, query, key, value1, value2, h):
    B, S, d_model = query.shape
    d_k = d_model // h

    # Fused q/k projections over (B*S, d_model) rows — taller MXU LHS, one launch.
    q2d, k2d = qk_projection(
        query.reshape(B * S, d_model), key.reshape(B * S, d_model),
        params["wq"], params["bq"], params["wk"], params["bk"])

    # Head split is a free (metadata-only) reshape — no HBM relayout passes.
    qh = q2d.reshape(B, S, h, d_k)
    kh = k2d.reshape(B, S, h, d_k)
    v1h = value1.reshape(B, S, h, d_k)
    v2h = value2.reshape(B, S, h, d_k)

    x1, x2 = attention_core(qh, kh, v1h, v2h)  # (B, S, d_model) each, lane-dense

    # Single fused output projection (shared wo/bo block) for both streams.
    o1, o2 = dual_output_projection(
        x1.reshape(B * S, d_model), x2.reshape(B * S, d_model),
        params["wo"], params["bo"])
    return o1.reshape(B, S, d_model), o2.reshape(B, S, d_model)


def reference(params, query, key, value1, value2, h):
    """Plain-JAX reference mirroring the PyTorch forward (eval mode)."""
    B, S, d_model = query.shape
    d_k = d_model // h

    def lin(x, w, b):
        return x @ w + b

    q = lin(query, params["wq"], params["bq"]).reshape(B, S, h, d_k).transpose(0, 2, 1, 3)
    k = lin(key, params["wk"], params["bk"]).reshape(B, S, h, d_k).transpose(0, 2, 1, 3)
    v1 = value1.reshape(B, S, h, d_k).transpose(0, 2, 1, 3)
    v2 = value2.reshape(B, S, h, d_k).transpose(0, 2, 1, 3)

    scores = jnp.einsum("bhqd,bhkd->bhqk", q, k) / math.sqrt(d_k)
    p = jax.nn.softmax(scores, axis=-1)
    x1 = jnp.einsum("bhqk,bhkd->bhqd", p, v1)
    x2 = jnp.einsum("bhqk,bhqd->bhkd", p, v2)  # p^T @ v2

    x1 = x1.transpose(0, 2, 1, 3).reshape(B, S, d_model)
    x2 = x2.transpose(0, 2, 1, 3).reshape(B, S, d_model)
    return lin(x1, params["wo"], params["bo"]), lin(x2, params["wo"], params["bo"])


# ----------------------------------- main -----------------------------------

if __name__ == "__main__":
    B, S, h, d_model = 2, 8, 4, 32

    key0 = jax.random.PRNGKey(0)
    keys = jax.random.split(key0, 10)

    bound = 1.0 / math.sqrt(d_model)
    params = {
        # weights stored as (d_in, d_out) (torch Linear weight transposed)
        "wq": jax.random.uniform(keys[0], (d_model, d_model), jnp.float32, -bound, bound),
        "bq": jax.random.uniform(keys[1], (d_model,), jnp.float32, -bound, bound),
        "wk": jax.random.uniform(keys[2], (d_model, d_model), jnp.float32, -bound, bound),
        "bk": jax.random.uniform(keys[3], (d_model,), jnp.float32, -bound, bound),
        "wo": jax.random.uniform(keys[4], (d_model, d_model), jnp.float32, -bound, bound),
        "bo": jax.random.uniform(keys[5], (d_model,), jnp.float32, -bound, bound),
    }

    query = jax.random.normal(keys[6], (B, S, d_model), jnp.float32)
    key_in = jax.random.normal(keys[7], (B, S, d_model), jnp.float32)
    value1 = jax.random.normal(keys[8], (B, S, d_model), jnp.float32)
    value2 = jax.random.normal(keys[9], (B, S, d_model), jnp.float32)

    out1, out2 = multi_headed_attention_con(params, query, key_in, value1, value2, h)
    out1 = jax.block_until_ready(out1)
    out2 = jax.block_until_ready(out2)

    ref1, ref2 = reference(params, query, key_in, value1, value2, h)

    assert out1.shape == (B, S, d_model) and out2.shape == (B, S, d_model)
    assert jnp.allclose(out1, ref1, rtol=1e-5, atol=1e-5), "out1 mismatch"
    assert jnp.allclose(out2, ref2, rtol=1e-5, atol=1e-5), "out2 mismatch"

    print("KERNEL_OK")
</pallas_src>

<mosaic_0001>
module attributes {stable_mosaic.version = 11 : i64} {
  func.func @_qk_proj_kernel(%arg0: i32, %arg1: memref<16x32xf32, #tpu.memory_space<vmem>>, %arg2: memref<16x32xf32, #tpu.memory_space<vmem>>, %arg3: memref<32x32xf32, #tpu.memory_space<vmem>>, %arg4: memref<1x32xf32, #tpu.memory_space<vmem>>, %arg5: memref<32x32xf32, #tpu.memory_space<vmem>>, %arg6: memref<1x32xf32, #tpu.memory_space<vmem>>, %arg7: memref<16x32xf32, #tpu.memory_space<vmem>>, %arg8: memref<16x32xf32, #tpu.memory_space<vmem>>) attributes {dimension_semantics = [#tpu.dimension_semantics<parallel>], iteration_bounds = array<i64: 1>, scalar_prefetch = 0 : i64, scratch_operands = 0 : i64, tpu.core_type = #tpu.core_type<tc>, window_params = [{transform_indices = @transform_0, window_bounds = array<i64: 16, 32>}, {transform_indices = @transform_1, window_bounds = array<i64: 16, 32>}, {pipeline_mode = #tpu.pipeline_mode<synchronous>, transform_indices = @transform_2, window_bounds = array<i64: 32, 32>}, {pipeline_mode = #tpu.pipeline_mode<synchronous>, transform_indices = @transform_3, window_bounds = array<i64: 1, 32>}, {pipeline_mode = #tpu.pipeline_mode<synchronous>, transform_indices = @transform_4, window_bounds = array<i64: 32, 32>}, {pipeline_mode = #tpu.pipeline_mode<synchronous>, transform_indices = @transform_5, window_bounds = array<i64: 1, 32>}, {transform_indices = @transform_6, window_bounds = array<i64: 16, 32>}, {transform_indices = @transform_7, window_bounds = array<i64: 16, 32>}]} {
    %c0 = arith.constant 0 : index
    %c0_0 = arith.constant 0 : index
    %0 = vector.load %arg1[%c0, %c0_0] : memref<16x32xf32, #tpu.memory_space<vmem>>, vector<16x32xf32>
    %c0_1 = arith.constant 0 : index
    %c0_2 = arith.constant 0 : index
    %1 = vector.load %arg3[%c0_1, %c0_2] : memref<32x32xf32, #tpu.memory_space<vmem>>, vector<32x32xf32>
    %cst = arith.constant dense<0.000000e+00> : vector<16x32xf32>
    %2 = tpu.matmul %0, %1, %cst {dimension_numbers = #tpu.dot_dimension_numbers<[1], [0], [0], [1], [0, 0, 1, 1], [], []>} : vector<16x32xf32>, vector<32x32xf32>, vector<16x32xf32> -> vector<16x32xf32>
    %c0_3 = arith.constant 0 : index
    %c0_4 = arith.constant 0 : index
    %3 = vector.load %arg4[%c0_3, %c0_4] : memref<1x32xf32, #tpu.memory_space<vmem>>, vector<1x32xf32>
    %4 = vector.broadcast %3 : vector<1x32xf32> to vector<16x32xf32>
    %5 = arith.addf %2, %4 : vector<16x32xf32>
    %c0_5 = arith.constant 0 : index
    %c0_6 = arith.constant 0 : index
    %6 = vector.load %arg7[%c0_5, %c0_6] : memref<16x32xf32, #tpu.memory_space<vmem>>, vector<16x32xf32>
    tpu.vector_store %arg7[%c0_5, %c0_6], %5 {strides = array<i32>} : memref<16x32xf32, #tpu.memory_space<vmem>>, vector<16x32xf32>,
    %c0_7 = arith.constant 0 : index
    %c0_8 = arith.constant 0 : index
    %7 = vector.load %arg2[%c0_7, %c0_8] : memref<16x32xf32, #tpu.memory_space<vmem>>, vector<16x32xf32>
    %c0_9 = arith.constant 0 : index
    %c0_10 = arith.constant 0 : index
    %8 = vector.load %arg5[%c0_9, %c0_10] : memref<32x32xf32, #tpu.memory_space<vmem>>, vector<32x32xf32>
    %cst_11 = arith.constant dense<0.000000e+00> : vector<16x32xf32>
    %9 = tpu.matmul %7, %8, %cst_11 {dimension_numbers = #tpu.dot_dimension_numbers<[1], [0], [0], [1], [0, 0, 1, 1], [], []>} : vector<16x32xf32>, vector<32x32xf32>, vector<16x32xf32> -> vector<16x32xf32>
    %c0_12 = arith.constant 0 : index
    %c0_13 = arith.constant 0 : index
    %10 = vector.load %arg6[%c0_12, %c0_13] : memref<1x32xf32, #tpu.memory_space<vmem>>, vector<1x32xf32>
    %11 = vector.broadcast %10 : vector<1x32xf32> to vector<16x32xf32>
    %12 = arith.addf %9, %11 : vector<16x32xf32>
    %c0_14 = arith.constant 0 : index
    %c0_15 = arith.constant 0 : index
    %13 = vector.load %arg8[%c0_14, %c0_15] : memref<16x32xf32, #tpu.memory_space<vmem>>, vector<16x32xf32>
    tpu.vector_store %arg8[%c0_14, %c0_15], %12 {strides = array<i32>} : memref<16x32xf32, #tpu.memory_space<vmem>>, vector<16x32xf32>,
    return
  }
  func.func @transform_0(%arg0: i32) -> (i32, i32) {
    %c0_i32 = arith.constant 0 : i32
    %c0_i32_0 = arith.constant 0 : i32
    return %arg0, %c0_i32 : i32, i32
  }
  func.func @transform_1(%arg0: i32) -> (i32, i32) {
    %c0_i32 = arith.constant 0 : i32
    %c0_i32_0 = arith.constant 0 : i32
    return %arg0, %c0_i32 : i32, i32
  }
  func.func @transform_2(%arg0: i32) -> (i32, i32) {
    %c0_i32 = arith.constant 0 : i32
    %c0_i32_0 = arith.constant 0 : i32
    %c0_i32_1 = arith.constant 0 : i32
    return %c0_i32, %c0_i32_0 : i32, i32
  }
  func.func @transform_3(%arg0: i32) -> (i32, i32) {
    %c0_i32 = arith.constant 0 : i32
    %c0_i32_0 = arith.constant 0 : i32
    %c0_i32_1 = arith.constant 0 : i32
    return %c0_i32, %c0_i32_0 : i32, i32
  }
  func.func @transform_4(%arg0: i32) -> (i32, i32) {
    %c0_i32 = arith.constant 0 : i32
    %c0_i32_0 = arith.constant 0 : i32
    %c0_i32_1 = arith.constant 0 : i32
    return %c0_i32, %c0_i32_0 : i32, i32
  }
  func.func @transform_5(%arg0: i32) -> (i32, i32) {
    %c0_i32 = arith.constant 0 : i32
    %c0_i32_0 = arith.constant 0 : i32
    %c0_i32_1 = arith.constant 0 : i32
    return %c0_i32, %c0_i32_0 : i32, i32
  }
  func.func @transform_6(%arg0: i32) -> (i32, i32) {
    %c0_i32 = arith.constant 0 : i32
    %c0_i32_0 = arith.constant 0 : i32
    return %arg0, %c0_i32 : i32, i32
  }
  func.func @transform_7(%arg0: i32) -> (i32, i32) {
    %c0_i32 = arith.constant 0 : i32
    %c0_i32_0 = arith.constant 0 : i32
    return %arg0, %c0_i32 : i32, i32
  }
}

</mosaic_0001>

<bundles_post_ra>
// kernel: tpu_custom_call.1
= control target key start
LH: loop header
LB: loop body
LE: loop exit
PB: predicated region body
PF: predicated region fallthrough
CT: control target
= control target key end

     0   :  { %13 = vsyncpa [#allocation3], 0  ;;  %s689_s0 = inlined_call_operand.hbm [shape: f32[16,32], index: 0, kind: input, shape index: {}]   ;;  %s690_s1 = inlined_call_operand.hbm [shape: f32[16,32], index: 1, kind: input, shape index: {}]   ;;  %s691_s2 = inlined_call_operand.hbm [shape: f32[32,32], index: 2, kind: input, shape index: {}]   ;;  %s692_s3 = inlined_call_operand.vmem [shape: f32[1,32], index: 3, kind: input, shape index: {}]   ;;  %s693_s4 = inlined_call_operand.hbm [shape: f32[32,32], index: 4, kind: input, shape index: {}]   ;;  %s694_s5 = inlined_call_operand.vmem [shape: f32[1,32], index: 5, kind: input, shape index: {}]   ;;  %s695_s6 = inlined_call_operand.hbm [shape: f32[16,32], index: 6, kind: output, shape index: {0}]   ;;  %s696_s7 = inlined_call_operand.hbm [shape: f32[16,32], index: 7, kind: output, shape index: {1}]  }
   0x1   :  { %14 = vsyncpa [#allocation6], 0 }
   0x2   :  { %15 = vsyncpa [#allocation9], 0 }
   0x3   :  { %16 = vsyncpa [#allocation4], 0 }
   0x4   :  { %17 = vsyncpa [#allocation12], 0  ;;  %s516_s24 = smov [#allocation5]   ;;  %s517_s26 = smov [#allocation2]  }
   0x5   :  { %s35_s25 = sshll.u32 %s516_s24, 4  ;;  %s23_s27 = sshll.u32 %s517_s26, 4  ;;  %s36_s25 = int_to_ptr.vmem [resolvable:$true] %s35_s25  ;;  %s564_s27 = int_to_ptr.vmem [resolvable:$true] %s23_s27 }
   0x6   :  { %s374_s30 = scalar_lea.hbm %s690_s1, 256 }
   0x7   :  { %p375_p0 = scmp.ne.s32.totalorder %s690_s1, %s374_s30  ;;  %p378_p1 = scmp.lt.u32.totalorder %s374_s30, %s690_s1 }
   0x9   :  { %p380_p2 = pnand %p378_p1, %p375_p0 }
   0xb   :  { %383 = shalt.err (!%p380_p2)
}
   0xc   :  { %s384_s12 = scalar_lea.vmem %s36_s25, 256  ;;  %p389_p4 = scmp.lt.s32.totalorder %s36_s25, %s36_s25 }
   0xd   :  { %p385_p3 = scmp.ne.s32.totalorder %s36_s25, %s384_s12  ;;  %p390_p5 = scmp.lt.s32.totalorder %s384_s12, %s384_s12 }
   0xf   :  { %p391_p6 = por %p390_p5, %p389_p4 }
  0x11   :  { %p392_p7 = pnand %p391_p6, %p385_p3 }
  0x13   :  { %395 = shalt.err (!%p392_p7)
}
  0x14   :  { %s518_s13 = smov 128   ;;  %s519_s14 = smov 8  }
  0x15   :  { %41 = dma.hbm_to_vmem [thread:$0]  %s690_s1, 256, %s36_s25, [#allocation6], %s518_s13, %s518_s13, %s519_s14  }
  0x16   :  { %s396_s19 = scalar_lea.hbm %s689_s0, 256 }
  0x17   :  { %p397_p8 = scmp.ne.s32.totalorder %s689_s0, %s396_s19  ;;  %p400_p9 = scmp.lt.u32.totalorder %s396_s19, %s689_s0 }
  0x19   :  { %p402_p10 = pnand %p400_p9, %p397_p8 }
  0x1b   :  { %405 = shalt.err (!%p402_p10)
}
  0x1c   :  { %s406_s24 = scalar_lea.vmem %s564_s27, 256  ;;  %p411_p12 = scmp.lt.s32.totalorder %s564_s27, %s564_s27 }
  0x1d   :  { %p407_p11 = scmp.ne.s32.totalorder %s564_s27, %s406_s24  ;;  %p412_p13 = scmp.lt.s32.totalorder %s406_s24, %s406_s24 }
  0x1f   :  { %p413_p0 = por %p412_p13, %p411_p12 }
  0x21   :  { %p414_p1 = pnand %p413_p0, %p407_p11 }
  0x23   :  { %417 = shalt.err (!%p414_p1)
}
  0x24   :  { %29 = dma.hbm_to_vmem [thread:$0]  %s689_s0, 256, %s564_s27, [#allocation3], %s518_s13, %s518_s13, %s519_s14  }
  0x25   :  { %s520_s26 = smov [#allocation7]   ;;  %s521_s29 = smov [#allocation8]  }
  0x26   :  { %s47_s28 = sshll.u32 %s520_s26, 4  ;;  %s61_s30 = sshll.u32 %s521_s29, 4  ;;  %s48_s28 = int_to_ptr.vmem [resolvable:$true] %s47_s28  ;;  %s601_s30 = int_to_ptr.vmem [resolvable:$true] %s61_s30 }
  0x27   :  { %s418_s10 = scalar_lea.hbm %s691_s2, 512 }
  0x28   :  { %p419_p2 = scmp.ne.s32.totalorder %s691_s2, %s418_s10  ;;  %p422_p3 = scmp.lt.u32.totalorder %s418_s10, %s691_s2 }
  0x2a   :  { %p424_p4 = pnand %p422_p3, %p419_p2 }
  0x2c   :  { %427 = shalt.err (!%p424_p4)
}
  0x2d   :  { %s428_s0 = scalar_lea.vmem %s48_s28, 512  ;;  %p433_p6 = scmp.lt.s32.totalorder %s48_s28, %s48_s28 }
  0x2e   :  { %p429_p5 = scmp.ne.s32.totalorder %s48_s28, %s428_s0  ;;  %p434_p7 = scmp.lt.s32.totalorder %s428_s0, %s428_s0 }
  0x30   :  { %p435_p8 = por %p434_p7, %p433_p6 }
  0x32   :  { %p436_p9 = pnand %p435_p8, %p429_p5 }
  0x34   :  { %439 = shalt.err (!%p436_p9)
}
  0x35   :  { %53 = dma.hbm_to_vmem [thread:$0]  %s691_s2, 512, %s48_s28, [#allocation6], %s518_s13, %s518_s13, %s519_s14  }
  0x36   :  { %s440_s20 = scalar_lea.hbm %s693_s4, 512 }
  0x37   :  { %p441_p10 = scmp.ne.s32.totalorder %s693_s4, %s440_s20  ;;  %p444_p11 = scmp.lt.u32.totalorder %s440_s20, %s693_s4 }
  0x39   :  { %p446_p12 = pnand %p444_p11, %p441_p10 }
  0x3b   :  { %449 = shalt.err (!%p446_p12)
}
  0x3c   :  { %s450_s1 = scalar_lea.vmem %s601_s30, 512  ;;  %p455_p0 = scmp.lt.s32.totalorder %s601_s30, %s601_s30 }
  0x3d   :  { %p451_p13 = scmp.ne.s32.totalorder %s601_s30, %s450_s1  ;;  %p456_p1 = scmp.lt.s32.totalorder %s450_s1, %s450_s1 }
  0x3f   :  { %p457_p2 = por %p456_p1, %p455_p0 }
  0x41   :  { %p458_p3 = pnand %p457_p2, %p451_p13 }
  0x43   :  { %461 = shalt.err (!%p458_p3)
}
  0x44   :  { %67 = dma.hbm_to_vmem [thread:$0]  %s693_s4, 512, %s601_s30, [#allocation9], %s518_s13, %s518_s13, %s519_s14  }
  0x45   :  { %506 = dma.done.wait [#allocation3], 256  }
  0x46   :  { %507 = vsyncadd [#allocation3], 4294967040 }
  0x47   :  { %508 = dma.done.wait [#allocation6], 768  }
  0x48   :  { %509 = vsyncadd [#allocation6], 4294966528 }
  0x49   :  { %510 = dma.done.wait [#allocation9], 512  }
  0x4a   :  { %511 = vsyncadd [#allocation9], 4294966784  ;;  %v84_v0 = vld [vmem:[#allocation7] sm:$0xff]  ;;  %v85_v1 = vld [vmem:[#allocation7 + $0x8] sm:$0xff]  ;;  %vm95_vm0 = vcmask 261120   ;;  %s522_s30 = smov [#allocation10]  }
  0x4b   :  { %v181_v2 = vld [vmem:[#allocation8] sm:$0xff]  ;;  %v350_v3 = vpack.c.bf16 %v85_v1, %v84_v0  ;;  %v182_v4 = vld [vmem:[#allocation8 + $0x8] sm:$0xff]  ;;  %v86_v5 = vld [vmem:[#allocation7 + $0x10] sm:$0xff]  ;;  %s280_s8 = sshll.u32 %s522_s30, 4  ;;  %s523_s9 = smov [#allocation11]   ;;  %s281_s8 = int_to_ptr.vmem [resolvable:$true] %s280_s8 }
  0x4c   :  { %v87_v6 = vld [vmem:[#allocation7 + $0x18] sm:$0xff]  ;;  %v358_v7 = vpack.c.bf16 %v182_v4, %v181_v2  ;;  %v183_v9 = vld [vmem:[#allocation8 + $0x10] sm:$0xff]  ;;  %v82_v11 = vld [vmem:[#allocation2] sm:$0xff]  ;;  %s292_s10 = sshll.u32 %s523_s9, 4  ;;  %p467_p5 = scmp.lt.s32.totalorder %s281_s8, %s281_s8  ;;  %s649_s10 = int_to_ptr.vmem [resolvable:$true] %s292_s10 }
  0x4d   :  { %v354_v8 = vpack.c.bf16 %v87_v6, %v86_v5  ;;  %v184_v10 = vld [vmem:[#allocation8 + $0x18] sm:$0xff]  ;;  %351 = vmatprep.subr.bf16.mxu0 %v350_v3  ;;  %336 = vmatprep.mubr.msk.f32.mxu0 %vm95_vm0, %v82_v11  ;;  %v179_v13 = vld [vmem:[#allocation5] sm:$0xff]  ;;  %v83_v14 = vld [vmem:[#allocation2 + $0x8] sm:$0xff] }
  0x4e   :  { %v362_v12 = vpack.c.bf16 %v184_v10, %v183_v9  ;;  %359 = vmatprep.subr.bf16.mxu1 %v358_v7  ;;  %353 = vmatpush3.bf16.msra.mxu0 %v350_v3  ;;  %v180_v15 = vld [vmem:[#allocation5 + $0x8] sm:$0xff]  ;;  %v310_v16 = vld [vmem:[%s692_s3] ss:$0 sm:$0xff]  ;;  %s462_s3 = scalar_lea.vmem %s281_s8, 256 }
  0x4f   :  { %361 = vmatpush3.bf16.msra.mxu1 %v358_v7  ;;  %355 = vmatprep.subr.bf16.mxu0 %v354_v8  ;;  %v313_v17 = vld [vmem:[%s694_s5] ss:$0 sm:$0xff]  ;;  %p463_p4 = scmp.ne.s32.totalorder %s281_s8, %s462_s3  ;;  %p468_p6 = scmp.lt.s32.totalorder %s462_s3, %s462_s3 }
  0x50   :  { %363 = vmatprep.subr.bf16.mxu1 %v362_v12  ;;  %347 = vmatprep.mubr.msk.f32.mxu1 %vm95_vm0, %v179_v13 }
  0x51   :  { %p469_p7 = por %p468_p6, %p467_p5 }
  0x52   :  { %357 = vmatpush3.bf16.msra.mxu0 %v354_v8 }
  0x53   :  { %365 = vmatpush3.bf16.msra.mxu1 %v362_v12  ;;  %p470_p8 = pnand %p469_p7, %p463_p4 }
  0x55   :  { %337 = vmatmul.mubr.msk.f32.vlgmr.msra.gmra.mrb[0].mxu0 %vm95_vm0, %v83_v14 }
  0x56   :  { %348 = vmatmul.mubr.msk.f32.vlgmr.msra.gmra.mrb[0].mxu1 %vm95_vm0, %v180_v15 }
 0x128   :  { %v338_v18 = vpop.f32.mrb[0].mxu0 }
 0x129   :  { %v174_v19 = vadd.f32 %v338_v18, %v310_v16  ;;  %v349_v20 = vpop.f32.mrb[0].mxu1  ;;  %v168_v21 = vpop.f32.mrb[1].mxu0 }
 0x12a   :  { %v270_v22 = vadd.f32 %v349_v20, %v313_v17  ;;  %v169_v23 = vadd.f32 %v310_v16, %v168_v21  ;;  %v264_v24 = vpop.f32.mrb[1].mxu1 }
 0x12b   :  { %178 = vst.msk [vmem:[#allocation10 + $0x8] sm:$0xff] %vm95_vm0, %v174_v19  ;;  %v265_v25 = vadd.f32 %v313_v17, %v264_v24 }
 0x12c   :  { %274 = vst.msk [vmem:[#allocation11 + $0x8] sm:$0xff] %vm95_vm0, %v270_v22  ;;  %177 = vst.msk [vmem:[#allocation10] sm:$0xff] %vm95_vm0, %v169_v23 }
 0x12d   :  { %273 = vst.msk [vmem:[#allocation11] sm:$0xff] %vm95_vm0, %v265_v25 }
 0x12e   :  { %473 = shalt.err (!%p470_p8)
}
 0x12f   :  { %s474_s12 = scalar_lea.hbm %s695_s6, 256 }
 0x130   :  { %p475_p9 = scmp.ne.s32.totalorder %s695_s6, %s474_s12  ;;  %p478_p10 = scmp.lt.u32.totalorder %s474_s12, %s695_s6 }
 0x132   :  { %p480_p11 = pnand %p478_p10, %p475_p9 }
 0x134   :  { %483 = shalt.err (!%p480_p11)
}
 0x135   :  { %286 = dma.vmem_to_hbm [thread:$0]  %s281_s8, 256, %s695_s6, [#allocation4], %s518_s13, %s518_s13, %s519_s14  }
 0x136   :  { %s484_s19 = scalar_lea.vmem %s649_s10, 256  ;;  %p489_p13 = scmp.lt.s32.totalorder %s649_s10, %s649_s10 }
 0x137   :  { %p485_p12 = scmp.ne.s32.totalorder %s649_s10, %s484_s19  ;;  %p490_p0 = scmp.lt.s32.totalorder %s484_s19, %s484_s19 }
 0x139   :  { %p491_p1 = por %p490_p0, %p489_p13 }
 0x13b   :  { %p492_p2 = pnand %p491_p1, %p485_p12 }
 0x13d   :  { %495 = shalt.err (!%p492_p2)
}
 0x13e   :  { %s496_s22 = scalar_lea.hbm %s696_s7, 256 }
 0x13f   :  { %p497_p3 = scmp.ne.s32.totalorder %s696_s7, %s496_s22  ;;  %p500_p4 = scmp.lt.u32.totalorder %s496_s22, %s696_s7 }
 0x141   :  { %p502_p5 = pnand %p500_p4, %p497_p3 }
 0x143   :  { %505 = shalt.err (!%p502_p5)
}
 0x144   :  { %298 = dma.vmem_to_hbm [thread:$0]  %s649_s10, 256, %s696_s7, [#allocation12], %s518_s13, %s518_s13, %s519_s14  }
 0x145   :  { %512 = dma.done.wait [#allocation4], 256  }
 0x146   :  { %513 = vsyncadd [#allocation4], 4294967040 }
 0x147   :  { %514 = dma.done.wait [#allocation12], 256  }
 0x148   :  { %515 = vsyncadd [#allocation12], 4294967040 }
 0x149   :  { %305 = vsyncpa [#allocation3], 1 }
 0x14a   :  { %306 = vsyncpa [#allocation6], 1 }
 0x14b   :  { %307 = vsyncpa [#allocation9], 1 }
 0x14c   :  { %308 = vsyncpa [#allocation4], 1 }
 0x14d   :  { %309 = vsyncpa [#allocation12], 1 }

</bundles_post_ra>
